<compile_context>
chip_gen: v6e
topology: v6e:2x2x1
jax: 0.10.0
libtpu: 0.0.40
codegen_flags: <defaults>
</compile_context>

<pallas_src>
import functools

import jax
import jax.numpy as jnp
from jax.experimental import pallas as pl
from jax.experimental.pallas import tpu as pltpu


def _hybrid_loss_kernel(x_ref, t_ref, a_ref, g_ref,          # inputs (VMEM)
                        focal_ref, inter_ref, union_ref,     # outputs (VMEM, resident)
                        *, n_total):
    p = pl.program_id(0)          # parallel axis (v7x: one per TensorCore)
    i = pl.program_id(1)          # reduction axis over sample tiles

    @pl.when(i == 0)
    def _init():
        focal_ref[...] = jnp.zeros_like(focal_ref)
        inter_ref[...] = jnp.zeros_like(inter_ref)
        union_ref[...] = jnp.zeros_like(union_ref)

    x = x_ref[...].astype(jnp.float32)            # (C, TN) logits
    t = t_ref[...]                                # (1, TN) int32 labels
    alpha = a_ref[...].astype(jnp.float32)        # (C, 1)
    gamma = g_ref[...].astype(jnp.float32)        # (C, 1)
    c, tn = x.shape

    # Validity mask for the (unpadded) tail: global sample id < n_total.
    g_tile = p * pl.num_programs(1) + i
    lane = jax.lax.broadcasted_iota(jnp.int32, (1, tn), 1)
    valid_b = (g_tile * tn + lane) < n_total                    # (1, TN) bool
    valid = valid_b.astype(jnp.float32)

    # Sanitize out-of-bounds tail data so garbage bits can't become NaN/Inf
    # after exp() (NaN * 0 would poison the accumulators).
    x = jnp.where(valid_b, x, 0.0)

    # --- softmax pieces over the class (sublane) axis ---
    m = jnp.max(x, axis=0, keepdims=True)                       # (1, TN)
    shifted = x - m
    ex = jnp.exp(shifted)
    denom = jnp.sum(ex, axis=0, keepdims=True)                  # (1, TN)
    logdenom = jnp.log(denom)
    # Exact reciprocal: approx=True can push p_t above 1 and costs accuracy;
    # the (1, TN) op is cheap either way.  Fold the validity mask in once.
    scale = pl.reciprocal(denom, approx=False) * valid
    sm_v = ex * scale                                           # masked softmax (C, TN)

    class_ids = jax.lax.broadcasted_iota(jnp.int32, (c, tn), 0)
    oh = jnp.where((class_ids == t) & valid_b, 1.0, 0.0)        # masked one-hot

    # --- focal partial sum ---
    gathered = jnp.sum(oh * shifted, axis=0, keepdims=True)     # shifted[target]
    ce = (logdenom - gathered) * valid                          # log-softmax CE, 0 if invalid
    prod = sm_v * oh                                            # reused for dice intersection
    p_t = jnp.sum(prod, axis=0, keepdims=True)                  # softmax[target], 0 if invalid
    alpha_t = jnp.sum(oh * alpha, axis=0, keepdims=True)
    gamma_t = jnp.sum(oh * gamma, axis=0, keepdims=True)
    one_minus = jnp.maximum(1.0 - p_t, 0.0)
    # (1-p_t)**gamma_t via exp/log (guaranteed Mosaic lowering); invalid cols
    # give exp(0 * log(1)) = 1 which is then zeroed by alpha_t = ce = 0.
    pow_term = jnp.exp(gamma_t * jnp.log(jnp.maximum(one_minus, 1e-30)))
    focal_ref[...] += jnp.sum(alpha_t * pow_term * ce)

    # --- dice partials (per class) ---
    inter_ref[...] += jnp.sum(prod, axis=1, keepdims=True)[None]            # (1, C, 1)
    union_ref[...] += (jnp.sum(sm_v, axis=1, keepdims=True)
                       + jnp.sum(oh, axis=1, keepdims=True))[None]          # (1, C, 1)


def _pick_tile_n(n_cols, c, itemsize, target_block_bytes=1 << 20):
    """Lane tile (multiple of 128).  ~1 MiB per logits block amortizes the
    ~0.35 us per-grid-step overhead while double-buffered inputs + compiler
    temporaries fit scoped VMEM on v5e/v6e/v7x (we raise the limit to 32 MiB)."""
    tn = target_block_bytes // max(1, c * itemsize)
    tn = max(128, (tn // 128) * 128)
    n_aligned = max(128, (n_cols // 128) * 128)   # keep block <= array extent
    return min(tn, n_aligned)


def hybrid_loss(inputs, targets, alpha, gamma,
                lambda1=0.5, lambda2=0.5, smooth=1.0,
                tile_n=None, class_major=False, num_parallel=2):
    """inputs: (N, C) float logits (f32 or bf16) -- or (C, N) if class_major;
    targets: (N,) int labels; alpha/gamma: (C,) focal params.  Returns scalar."""
    if class_major:
        c, n = inputs.shape
        x_t = inputs
    else:
        n, c = inputs.shape
        x_t = inputs.T                       # single HBM copy (layout change)

    t_i = targets.astype(jnp.int32).reshape(1, n)

    # Only pad when N < 128 (so no block exceeds the array extent); otherwise
    # the partial tail block is handled by the in-kernel validity mask.
    if n < 128:
        pad = 128 - n
        x_t = jnp.pad(x_t, ((0, 0), (0, pad)))
        t_i = jnp.pad(t_i, ((0, 0), (0, pad)))
        n_cols = 128
    else:
        n_cols = n

    if tile_n is None:
        tile_n = _pick_tile_n(n_cols, c, inputs.dtype.itemsize)
    tile_n = min(tile_n, max(128, (n_cols // 128) * 128))
    assert tile_n % 128 == 0

    n_tiles = pl.cdiv(n_cols, tile_n)
    n_par = max(1, min(num_parallel, n_tiles))   # 2 -> both v7x TensorCores
    tpp = pl.cdiv(n_tiles, n_par)                # tiles per parallel slice
    grid = (n_par, tpp)
    last_tile = n_tiles - 1

    # Clamp the tile index so "extra" grid cells (n_par*tpp > n_tiles) re-fetch
    # a valid block; their contributions are zeroed by the validity mask.
    def x_map(p, i):
        return (0, jnp.minimum(p * tpp + i, last_tile))

    def t_map(p, i):
        return (0, jnp.minimum(p * tpp + i, last_tile))

    def const_map(p, i):
        return (0, 0)

    a2 = alpha.reshape(c, 1)
    g2 = gamma.reshape(c, 1)

    out_shape = (jax.ShapeDtypeStruct((n_par, 1, 1), jnp.float32),   # focal partials
                 jax.ShapeDtypeStruct((n_par, c, 1), jnp.float32),   # dice intersection
                 jax.ShapeDtypeStruct((n_par, c, 1), jnp.float32))   # dice union
    out_specs = (pl.BlockSpec((1, 1, 1), lambda p, i: (p, 0, 0)),
                 pl.BlockSpec((1, c, 1), lambda p, i: (p, 0, 0)),
                 pl.BlockSpec((1, c, 1), lambda p, i: (p, 0, 0)))

    focal_p, inter_p, union_p = pl.pallas_call(
        functools.partial(_hybrid_loss_kernel, n_total=n),
        out_shape=out_shape,
        grid=grid,
        in_specs=[
            pl.BlockSpec((c, tile_n), x_map),
            pl.BlockSpec((1, tile_n), t_map),
            pl.BlockSpec((c, 1), const_map),
            pl.BlockSpec((c, 1), const_map),
        ],
        out_specs=out_specs,
        compiler_params=pltpu.CompilerParams(
            dimension_semantics=("parallel", "arbitrary"),   # N tiles = reduction
            vmem_limit_bytes=32 * 1024 * 1024),
    )(x_t, t_i, a2, g2)

    # Tiny O(C) epilogue in the wrapper (lets both v7x cores own their partials).
    focal = jnp.sum(focal_p) / jnp.float32(n)
    inter = jnp.sum(inter_p, axis=0)[:, 0]
    union = jnp.sum(union_p, axis=0)[:, 0]
    dice = (2.0 * inter + smooth) / (union + smooth)
    dice_loss = 1.0 - jnp.mean(dice)
    return lambda1 * focal + lambda2 * dice_loss


def hybrid_loss_ref(inputs, targets, alpha, gamma,
                    lambda1=0.5, lambda2=0.5, smooth=1.0):
    """Pure-JAX reference mirroring the PyTorch module."""
    x = inputs.astype(jnp.float32)
    logsm = jax.nn.log_softmax(x, axis=1)
    ce = -jnp.take_along_axis(logsm, targets[:, None], axis=1)[:, 0]
    p_t = jnp.exp(-ce)
    focal = jnp.mean(alpha[targets] * (1.0 - p_t) ** gamma[targets] * ce)
    sm = jax.nn.softmax(x, axis=1)
    onehot = jax.nn.one_hot(targets, x.shape[1], dtype=jnp.float32)
    inter = jnp.sum(sm * onehot, axis=0)
    union = jnp.sum(sm, axis=0) + jnp.sum(onehot, axis=0)
    dice = (2.0 * inter + smooth) / (union + smooth)
    dice_loss = 1.0 - jnp.mean(dice)
    return lambda1 * focal + lambda2 * dice_loss


if __name__ == "__main__":
    key = jax.random.PRNGKey(0)
    k1, k2, k3, k4 = jax.random.split(key, 4)

    # Case 1: N=200, C=8 -> 2 tiles of 128, one per parallel slice; exercises
    # the partial-tail masking and the cross-slice combine.
    N, C = 200, 8
    inputs = jax.random.normal(k1, (N, C), dtype=jnp.float32)
    targets = jax.random.randint(k2, (N,), 0, C, dtype=jnp.int32)
    alpha = jax.random.uniform(k3, (C,), dtype=jnp.float32, minval=0.25, maxval=1.0)
    gamma = jax.random.uniform(k4, (C,), dtype=jnp.float32, minval=1.0, maxval=3.0)

    out = jax.block_until_ready(hybrid_loss(inputs, targets, alpha, gamma))
    ref = hybrid_loss_ref(inputs, targets, alpha, gamma)
    assert jnp.allclose(out, ref, rtol=3e-5, atol=3e-5), (out, ref)

    # Case 2: N=600, forced tile_n=128 -> 5 tiles over 2 parallel slices
    # (uneven split -> one clamped duplicate cell) + multi-step accumulation.
    N2 = 600
    inputs2 = jax.random.normal(k1, (N2, C), dtype=jnp.float32)
    targets2 = jax.random.randint(k2, (N2,), 0, C, dtype=jnp.int32)
    out2 = jax.block_until_ready(
        hybrid_loss(inputs2, targets2, alpha, gamma,
                    lambda1=0.7, lambda2=0.3, smooth=0.5, tile_n=128))
    ref2 = hybrid_loss_ref(inputs2, targets2, alpha, gamma,
                           lambda1=0.7, lambda2=0.3, smooth=0.5)
    assert jnp.allclose(out2, ref2, rtol=3e-5, atol=3e-5), (out2, ref2)

    # Case 3: bf16 logits (upcast inside the kernel).
    inputs3 = inputs.astype(jnp.bfloat16)
    out3 = jax.block_until_ready(hybrid_loss(inputs3, targets, alpha, gamma))
    ref3 = hybrid_loss_ref(inputs3, targets, alpha, gamma)
    assert jnp.allclose(out3, ref3, rtol=3e-5, atol=3e-5), (out3, ref3)

    print("KERNEL_OK")
</pallas_src>

<mosaic_0001>
module attributes {stable_mosaic.version = 11 : i64} {
  func.func @_hybrid_loss_kernel(%arg0: i32, %arg1: i32, %arg2: memref<8x128xf32, #tpu.memory_space<vmem>>, %arg3: memref<1x128xi32, #tpu.memory_space<vmem>>, %arg4: memref<8x1xf32, #tpu.memory_space<vmem>>, %arg5: memref<8x1xf32, #tpu.memory_space<vmem>>, %arg6: memref<1x1x1xf32, #tpu.memory_space<vmem>>, %arg7: memref<1x8x1xf32, #tpu.memory_space<vmem>>, %arg8: memref<1x8x1xf32, #tpu.memory_space<vmem>>) attributes {dimension_semantics = [#tpu.dimension_semantics<parallel>, #tpu.dimension_semantics<arbitrary>], iteration_bounds = array<i64: 2, 1>, scalar_prefetch = 0 : i64, scratch_operands = 0 : i64, tpu.core_type = #tpu.core_type<tc>, window_params = [{transform_indices = @transform_0, window_bounds = array<i64: 8, 128>}, {transform_indices = @transform_1, window_bounds = array<i64: 1, 128>}, {pipeline_mode = #tpu.pipeline_mode<synchronous>, transform_indices = @transform_2, window_bounds = array<i64: 8, 1>}, {pipeline_mode = #tpu.pipeline_mode<synchronous>, transform_indices = @transform_3, window_bounds = array<i64: 8, 1>}, {transform_indices = @transform_4, window_bounds = array<i64: 1, 1, 1>}, {transform_indices = @transform_5, window_bounds = array<i64: 1, 8, 1>}, {transform_indices = @transform_6, window_bounds = array<i64: 1, 8, 1>}]} {
    %c0_i32 = arith.constant 0 : i32
    %0 = arith.cmpi eq, %arg1, %c0_i32 : i32
    %1 = arith.extui %0 : i1 to i32
    %c0_i32_0 = arith.constant 0 : i32
    %2 = arith.cmpi ne, %1, %c0_i32_0 : i32
    scf.if %2 {
      %cst_41 = arith.constant 0.000000e+00 : f32
      %91 = vector.broadcast %cst_41 : f32 to vector<1x1x1xf32>
      %c0_42 = arith.constant 0 : index
      %c0_43 = arith.constant 0 : index
      %c0_44 = arith.constant 0 : index
      %92 = vector.load %arg6[%c0_42, %c0_43, %c0_44] : memref<1x1x1xf32, #tpu.memory_space<vmem>>, vector<1x1x1xf32>
      tpu.vector_store %arg6[%c0_42, %c0_43, %c0_44], %91 {strides = array<i32>} : memref<1x1x1xf32, #tpu.memory_space<vmem>>, vector<1x1x1xf32>,
      %cst_45 = arith.constant 0.000000e+00 : f32
      %93 = vector.broadcast %cst_45 : f32 to vector<1x8x1xf32>
      %c0_46 = arith.constant 0 : index
      %c0_47 = arith.constant 0 : index
      %c0_48 = arith.constant 0 : index
      %94 = vector.load %arg7[%c0_46, %c0_47, %c0_48] : memref<1x8x1xf32, #tpu.memory_space<vmem>>, vector<1x8x1xf32>
      tpu.vector_store %arg7[%c0_46, %c0_47, %c0_48], %93 {strides = array<i32>} : memref<1x8x1xf32, #tpu.memory_space<vmem>>, vector<1x8x1xf32>,
      %cst_49 = arith.constant 0.000000e+00 : f32
      %95 = vector.broadcast %cst_49 : f32 to vector<1x8x1xf32>
      %c0_50 = arith.constant 0 : index
      %c0_51 = arith.constant 0 : index
      %c0_52 = arith.constant 0 : index
      %96 = vector.load %arg8[%c0_50, %c0_51, %c0_52] : memref<1x8x1xf32, #tpu.memory_space<vmem>>, vector<1x8x1xf32>
      tpu.vector_store %arg8[%c0_50, %c0_51, %c0_52], %95 {strides = array<i32>} : memref<1x8x1xf32, #tpu.memory_space<vmem>>, vector<1x8x1xf32>,
    } else {
    }
    %c0 = arith.constant 0 : index
    %c0_1 = arith.constant 0 : index
    %3 = vector.load %arg2[%c0, %c0_1] : memref<8x128xf32, #tpu.memory_space<vmem>>, vector<8x128xf32>
    %c0_2 = arith.constant 0 : index
    %c0_3 = arith.constant 0 : index
    %4 = vector.load %arg3[%c0_2, %c0_3] : memref<1x128xi32, #tpu.memory_space<vmem>>, vector<1x128xi32>
    %c0_4 = arith.constant 0 : index
    %c0_5 = arith.constant 0 : index
    %5 = vector.load %arg4[%c0_4, %c0_5] : memref<8x1xf32, #tpu.memory_space<vmem>>, vector<8x1xf32>
    %c0_6 = arith.constant 0 : index
    %c0_7 = arith.constant 0 : index
    %6 = vector.load %arg5[%c0_6, %c0_7] : memref<8x1xf32, #tpu.memory_space<vmem>>, vector<8x1xf32>
    %c1_i32 = arith.constant 1 : i32
    %7 = arith.muli %arg0, %c1_i32 : i32
    %8 = arith.addi %7, %arg1 : i32
    %9 = tpu.iota {dimensions = array<i32: 1>} : vector<1x128xi32>
    %c128_i32 = arith.constant 128 : i32
    %10 = arith.muli %8, %c128_i32 : i32
    %11 = vector.broadcast %10 : i32 to vector<1x128xi32>
    %12 = arith.addi %11, %9 : vector<1x128xi32>
    %c200_i32 = arith.constant 200 : i32
    %13 = vector.broadcast %c200_i32 : i32 to vector<1x128xi32>
    %14 = arith.cmpi slt, %12, %13 : vector<1x128xi32>
    %15 = arith.extui %14 : vector<1x128xi1> to vector<1x128xi32>
    %16 = arith.sitofp %15 : vector<1x128xi32> to vector<1x128xf32>
    %cst = arith.constant 0.000000e+00 : f32
    %17 = vector.shape_cast %14 : vector<1x128xi1> to vector<1x128xi1>
    %18 = vector.broadcast %17 : vector<1x128xi1> to vector<8x128xi1>
    %19 = vector.broadcast %cst : f32 to vector<8x128xf32>
    %20 = arith.select %18, %3, %19 : vector<8x128xi1>, vector<8x128xf32>
    %cst_8 = arith.constant dense<0xFF800000> : vector<128xf32>
    %21 = vector.multi_reduction <maximumf>, %20, %cst_8 [0] : vector<8x128xf32> to vector<128xf32>
    %22 = vector.shape_cast %21 : vector<128xf32> to vector<1x128xf32>
    %23 = vector.broadcast %22 : vector<1x128xf32> to vector<8x128xf32>
    %24 = arith.subf %20, %23 : vector<8x128xf32>
    %25 = math.exp %24 : vector<8x128xf32>
    %cst_9 = arith.constant dense<0.000000e+00> : vector<128xf32>
    %26 = vector.multi_reduction <add>, %25, %cst_9 [0] : vector<8x128xf32> to vector<128xf32>
    %27 = vector.shape_cast %26 : vector<128xf32> to vector<1x128xf32>
    %28 = math.log %27 : vector<1x128xf32>
    %29 = tpu.reciprocal %27 : vector<1x128xf32> -> vector<1x128xf32>
    %30 = arith.mulf %29, %16 : vector<1x128xf32>
    %31 = vector.broadcast %30 : vector<1x128xf32> to vector<8x128xf32>
    %32 = arith.mulf %25, %31 : vector<8x128xf32>
    %33 = tpu.iota {dimensions = array<i32: 0>} : vector<8x128xi32>
    %34 = vector.broadcast %4 : vector<1x128xi32> to vector<8x128xi32>
    %35 = arith.cmpi eq, %33, %34 : vector<8x128xi32>
    %36 = vector.broadcast %14 : vector<1x128xi1> to vector<8x128xi1>
    %37 = arith.andi %35, %36 : vector<8x128xi1>
    %cst_10 = arith.constant 1.000000e+00 : f32
    %cst_11 = arith.constant 0.000000e+00 : f32
    %38 = vector.broadcast %cst_10 : f32 to vector<8x128xf32>
    %39 = vector.broadcast %cst_11 : f32 to vector<8x128xf32>
    %40 = arith.select %37, %38, %39 : vector<8x128xi1>, vector<8x128xf32>
    %41 = arith.mulf %40, %24 : vector<8x128xf32>
    %cst_12 = arith.constant dense<0.000000e+00> : vector<128xf32>
    %42 = vector.multi_reduction <add>, %41, %cst_12 [0] : vector<8x128xf32> to vector<128xf32>
    %43 = vector.shape_cast %42 : vector<128xf32> to vector<1x128xf32>
    %44 = arith.subf %28, %43 : vector<1x128xf32>
    %45 = arith.mulf %44, %16 : vector<1x128xf32>
    %46 = arith.mulf %32, %40 : vector<8x128xf32>
    %cst_13 = arith.constant dense<0.000000e+00> : vector<128xf32>
    %47 = vector.multi_reduction <add>, %46, %cst_13 [0] : vector<8x128xf32> to vector<128xf32>
    %48 = vector.shape_cast %47 : vector<128xf32> to vector<1x128xf32>
    %49 = vector.broadcast %5 : vector<8x1xf32> to vector<8x128xf32>
    %50 = arith.mulf %40, %49 : vector<8x128xf32>
    %cst_14 = arith.constant dense<0.000000e+00> : vector<128xf32>
    %51 = vector.multi_reduction <add>, %50, %cst_14 [0] : vector<8x128xf32> to vector<128xf32>
    %52 = vector.shape_cast %51 : vector<128xf32> to vector<1x128xf32>
    %53 = vector.broadcast %6 : vector<8x1xf32> to vector<8x128xf32>
    %54 = arith.mulf %40, %53 : vector<8x128xf32>
    %cst_15 = arith.constant dense<0.000000e+00> : vector<128xf32>
    %55 = vector.multi_reduction <add>, %54, %cst_15 [0] : vector<8x128xf32> to vector<128xf32>
    %56 = vector.shape_cast %55 : vector<128xf32> to vector<1x128xf32>
    %cst_16 = arith.constant 1.000000e+00 : f32
    %57 = vector.broadcast %cst_16 : f32 to vector<1x128xf32>
    %58 = arith.subf %57, %48 : vector<1x128xf32>
    %cst_17 = arith.constant 0.000000e+00 : f32
    %59 = vector.broadcast %cst_17 : f32 to vector<1x128xf32>
    %60 = arith.maximumf %58, %59 : vector<1x128xf32>
    %cst_18 = arith.constant 1.000000e-30 : f32
    %61 = vector.broadcast %cst_18 : f32 to vector<1x128xf32>
    %62 = arith.maximumf %60, %61 : vector<1x128xf32>
    %63 = math.log %62 : vector<1x128xf32>
    %64 = arith.mulf %56, %63 : vector<1x128xf32>
    %65 = math.exp %64 : vector<1x128xf32>
    %c0_19 = arith.constant 0 : index
    %c0_20 = arith.constant 0 : index
    %c0_21 = arith.constant 0 : index
    %66 = vector.load %arg6[%c0_19, %c0_20, %c0_21] : memref<1x1x1xf32, #tpu.memory_space<vmem>>, vector<1x1x1xf32>
    %67 = arith.mulf %52, %65 : vector<1x128xf32>
    %68 = arith.mulf %67, %45 : vector<1x128xf32>
    %69 = vector.shape_cast %68 : vector<1x128xf32> to vector<1x1x128xf32>
    %cst_22 = arith.constant dense<0.000000e+00> : vector<1xf32>
    %70 = vector.multi_reduction <add>, %69, %cst_22 [1, 2] : vector<1x1x128xf32> to vector<1xf32>
    %71 = vector.shape_cast %70 : vector<1xf32> to vector<1x1x1xf32>
    %72 = vector.extract %71[0, 0, 0] : f32 from vector<1x1x1xf32>
    %73 = vector.broadcast %72 : f32 to vector<1x1x1xf32>
    %74 = arith.addf %66, %73 : vector<1x1x1xf32>
    %c0_23 = arith.constant 0 : index
    %c0_24 = arith.constant 0 : index
    %c0_25 = arith.constant 0 : index
    %75 = vector.load %arg6[%c0_23, %c0_24, %c0_25] : memref<1x1x1xf32, #tpu.memory_space<vmem>>, vector<1x1x1xf32>
    tpu.vector_store %arg6[%c0_23, %c0_24, %c0_25], %74 {strides = array<i32>} : memref<1x1x1xf32, #tpu.memory_space<vmem>>, vector<1x1x1xf32>,
    %c0_26 = arith.constant 0 : index
    %c0_27 = arith.constant 0 : index
    %c0_28 = arith.constant 0 : index
    %76 = vector.load %arg7[%c0_26, %c0_27, %c0_28] : memref<1x8x1xf32, #tpu.memory_space<vmem>>, vector<1x8x1xf32>
    %cst_29 = arith.constant dense<0.000000e+00> : vector<8xf32>
    %77 = vector.multi_reduction <add>, %46, %cst_29 [1] : vector<8x128xf32> to vector<8xf32>
    %78 = vector.shape_cast %77 : vector<8xf32> to vector<8x1xf32>
    %79 = vector.shape_cast %78 : vector<8x1xf32> to vector<1x8x1xf32>
    %80 = arith.addf %76, %79 : vector<1x8x1xf32>
    %c0_30 = arith.constant 0 : index
    %c0_31 = arith.constant 0 : index
    %c0_32 = arith.constant 0 : index
    %81 = vector.load %arg7[%c0_30, %c0_31, %c0_32] : memref<1x8x1xf32, #tpu.memory_space<vmem>>, vector<1x8x1xf32>
    tpu.vector_store %arg7[%c0_30, %c0_31, %c0_32], %80 {strides = array<i32>} : memref<1x8x1xf32, #tpu.memory_space<vmem>>, vector<1x8x1xf32>,
    %c0_33 = arith.constant 0 : index
    %c0_34 = arith.constant 0 : index
    %c0_35 = arith.constant 0 : index
    %82 = vector.load %arg8[%c0_33, %c0_34, %c0_35] : memref<1x8x1xf32, #tpu.memory_space<vmem>>, vector<1x8x1xf32>
    %cst_36 = arith.constant dense<0.000000e+00> : vector<8xf32>
    %83 = vector.multi_reduction <add>, %32, %cst_36 [1] : vector<8x128xf32> to vector<8xf32>
    %84 = vector.shape_cast %83 : vector<8xf32> to vector<8x1xf32>
    %cst_37 = arith.constant dense<0.000000e+00> : vector<8xf32>
    %85 = vector.multi_reduction <add>, %40, %cst_37 [1] : vector<8x128xf32> to vector<8xf32>
    %86 = vector.shape_cast %85 : vector<8xf32> to vector<8x1xf32>
    %87 = arith.addf %84, %86 : vector<8x1xf32>
    %88 = vector.shape_cast %87 : vector<8x1xf32> to vector<1x8x1xf32>
    %89 = arith.addf %82, %88 : vector<1x8x1xf32>
    %c0_38 = arith.constant 0 : index
    %c0_39 = arith.constant 0 : index
    %c0_40 = arith.constant 0 : index
    %90 = vector.load %arg8[%c0_38, %c0_39, %c0_40] : memref<1x8x1xf32, #tpu.memory_space<vmem>>, vector<1x8x1xf32>
    tpu.vector_store %arg8[%c0_38, %c0_39, %c0_40], %89 {strides = array<i32>} : memref<1x8x1xf32, #tpu.memory_space<vmem>>, vector<1x8x1xf32>,
    return
  }
  func.func @transform_0(%arg0: i32, %arg1: i32) -> (i32, i32) {
    %c1_i32 = arith.constant 1 : i32
    %0 = arith.muli %arg0, %c1_i32 : i32
    %1 = arith.addi %0, %arg1 : i32
    %c1_i32_0 = arith.constant 1 : i32
    %2 = arith.minsi %1, %c1_i32_0 : i32
    %c0_i32 = arith.constant 0 : i32
    %c0_i32_1 = arith.constant 0 : i32
    return %c0_i32, %2 : i32, i32
  }
  func.func @transform_1(%arg0: i32, %arg1: i32) -> (i32, i32) {
    %c1_i32 = arith.constant 1 : i32
    %0 = arith.muli %arg0, %c1_i32 : i32
    %1 = arith.addi %0, %arg1 : i32
    %c1_i32_0 = arith.constant 1 : i32
    %2 = arith.minsi %1, %c1_i32_0 : i32
    %c0_i32 = arith.constant 0 : i32
    %c0_i32_1 = arith.constant 0 : i32
    return %c0_i32, %2 : i32, i32
  }
  func.func @transform_2(%arg0: i32, %arg1: i32) -> (i32, i32) {
    %c0_i32 = arith.constant 0 : i32
    %c0_i32_0 = arith.constant 0 : i32
    %c0_i32_1 = arith.constant 0 : i32
    return %c0_i32, %c0_i32_0 : i32, i32
  }
  func.func @transform_3(%arg0: i32, %arg1: i32) -> (i32, i32) {
    %c0_i32 = arith.constant 0 : i32
    %c0_i32_0 = arith.constant 0 : i32
    %c0_i32_1 = arith.constant 0 : i32
    return %c0_i32, %c0_i32_0 : i32, i32
  }
  func.func @transform_4(%arg0: i32, %arg1: i32) -> (i32, i32, i32) {
    %c0_i32 = arith.constant 0 : i32
    %c0_i32_0 = arith.constant 0 : i32
    %c0_i32_1 = arith.constant 0 : i32
    return %arg0, %c0_i32, %c0_i32_0 : i32, i32, i32
  }
  func.func @transform_5(%arg0: i32, %arg1: i32) -> (i32, i32, i32) {
    %c0_i32 = arith.constant 0 : i32
    %c0_i32_0 = arith.constant 0 : i32
    %c0_i32_1 = arith.constant 0 : i32
    return %arg0, %c0_i32, %c0_i32_0 : i32, i32, i32
  }
  func.func @transform_6(%arg0: i32, %arg1: i32) -> (i32, i32, i32) {
    %c0_i32 = arith.constant 0 : i32
    %c0_i32_0 = arith.constant 0 : i32
    %c0_i32_1 = arith.constant 0 : i32
    return %arg0, %c0_i32, %c0_i32_0 : i32, i32, i32
  }
}

</mosaic_0001>

<bundles_post_ra>
// kernel: tpu_custom_call.1
= control target key start
LH: loop header
LB: loop body
LE: loop exit
PB: predicated region body
PF: predicated region fallthrough
CT: control target
= control target key end

     0   :  { %s712_s21 = smov 0   ;;  %s714_s22 = smov 0   ;;  %s779_s0 = inlined_call_operand.vmem [shape: f32[8,200], index: 0, kind: input, shape index: {}]   ;;  %s780_s1 = inlined_call_operand.vmem [shape: s32[1,200], index: 1, kind: input, shape index: {}]   ;;  %s781_s2 = inlined_call_operand.vmem [shape: f32[8,1], index: 2, kind: input, shape index: {}]   ;;  %s782_s3 = inlined_call_operand.vmem [shape: f32[8,1], index: 3, kind: input, shape index: {}]   ;;  %s783_s4 = inlined_call_operand.vmem [shape: f32[2,1,1], index: 4, kind: output, shape index: {0}]   ;;  %s784_s5 = inlined_call_operand.vmem [shape: f32[2,8,1], index: 5, kind: output, shape index: {1}]   ;;  %s785_s6 = inlined_call_operand.vmem [shape: f32[2,8,1], index: 6, kind: output, shape index: {2}]  }
   0x1   :  { %s716_s23 = smov 0  }
   0x2 LB: > { %s29_s24 = sadd.s32 1, %s669_s22  ;;  %p597_p0 = scmp.ge.s32.totalorder %s673_s23, 1  ;;  %s673_s23 = sphi %s716_s23, %s17_s23   ;;  %s669_s22 = sphi %s714_s22, %s787_s22   ;;  %s665_s21 = sphi %s712_s21, %s786_s21  }
   0x3   : > { %p31_p1 = scmp.ge.s32.totalorder %s29_s24, 2  ;;  %p260_p2 = scmp.lt.s32.totalorder %s673_s23, 3 }
   0x5   : > { %s789_s24 = smov (%p31_p1, %s29_s24), 0  ;;  %p261_p3 = pnand %p597_p0, %p260_p2 }
   0x6   : > { %s607_s27 = sshll.u32 (!%p261_p3), %s665_s21, 7  ;;  %p305_p4 = scmp.lt.s32.totalorder (!%p261_p3), %s665_s21, 1 }
   0x7   : > { %264 = sbr.rel (%p261_p3) target bundleno = 379 (0x17b), region = 36 }
   0xc   : > { %v346_v0 = vld [vmem:[%s782_s3] sm:$0xff]  ;;  %v348_v1 = vlaneseq  ;;  %v675_v2 = vmov 0   ;;  %v351_v3 = vstv %s607_s27  ;;  %s791_s21 = smov (!%p305_p4, %s665_s21), 1  ;;  %v676_v19 = vmov 0.0  }
   0xd   : > { %640 = vset.pattern.permute.xlu0 %v675_v2  ;;  %v345_v5 = vld [vmem:[%s781_s2] sm:$0xff]  ;;  %s308_s30 = scalar_select %p305_p4, %s791_s21, 1  ;;  %vm438_vm3 = vcmask 1040384   ;;  %vm340_vm4 = vcmask 7168   ;;  %vm338_vm5 = vcmask 0  }
   0xe   : > { %417 = vperm.xlu0 %640, %v346_v0   ;;  %v349_v4 = vand.u32 127, %v348_v1  ;;  %v379_v17 = vshrl.u32 %v348_v1, 7  ;;  %s605_s14 = sshll.u32 %s791_s21, 3  ;;  %s325_s17 = scalar_lea.vmem %s783_s4, %s791_s21 }
   0xf   : > { %s601_s7 = sshll.u32 %s308_s30, 3  ;;  %s319_s13 = scalar_lea.vmem %s780_s1, %s308_s30  ;;  %339 = vst.msk [vmem:[%s325_s17] sm:$0x1] %vm338_vm5, %v676_v19 }
  0x10   : > { %v352_v6 = vadd.s32 %v351_v3, %v349_v4  ;;  %s310_s10 = scalar_lea.vmem %s779_s0, %s601_s7  ;;  %v609_v18 = vld [vmem:[%s319_s13] ss:$0 sm:$0xff]  ;;  %s333_s20 = scalar_lea.vmem %s785_s6, %s605_s14 }
  0x11   : > { %v343_v7 = vld [vmem:[%s310_s10] sm:$0xff]  ;;  %vm384_vm1 = vcmp.eq.s32.totalorder %v379_v17, %v609_v18  ;;  %342 = vst.msk [vmem:[%s333_s20] sm:$0xff] %vm340_vm4, %v676_v19  ;;  %s329_s27 = scalar_lea.vmem %s784_s5, %s605_s14 }
  0x12   : > { %405 = vperm.xlu0 %640, %v345_v5   ;;  %vm353_vm0 = vcmp.lt.s32.totalorder %v352_v6, 200  ;;  %341 = vst.msk [vmem:[%s329_s27] sm:$0xff] %vm340_vm4, %v676_v19 }
  0x13   : > { %v357_v8 = vsel %vm353_vm0, %v343_v7, 0.0  ;;  %vm385_vm2 = vmand %vm384_vm1, %vm353_vm0  ;;  %v608_v39 = vsel %vm353_vm0, 1.0, %v676_v19 }
  0x14   : > { %v358_v9 = vrot.slane %v357_v8, 4  ;;  %v386_v20 = vsel %vm385_vm2, 1.0, %v676_v19 }
  0x16   : > { %v359_v10 = vmax.f32 %v357_v8, %v358_v9  ;;  %v435_v19 = vld [vmem:[%s325_s17] sm:$0x1] }
  0x18   : > { %v360_v11 = vrot.slane %v359_v10, 2  ;;  %v459_v17 = vld [vmem:[%s333_s20] sm:$0xff] }
  0x1a   : > { %v361_v12 = vmax.f32 %v359_v10, %v360_v11 }
  0x1c   : > { %v362_v13 = vrot.slane %v361_v12, 1 }
  0x1e   : > { %v363_v14 = vmax.f32 %v361_v12, %v362_v13 }
  0x20   : > { %v364_v15 = vsub.f32 %v357_v8, %v363_v14 }
  0x22   : > { %v365_v16 = vmul.f32 1.442695, %v364_v15  ;;  %v387_v22 = vmul.f32 %v386_v20, %v364_v15 }
  0x24   : > { %641 = vpow2.f32 %v365_v16  ;;  %v388_v26 = vrot.slane %v387_v22, 4 }
  0x26   : > { %v389_v29 = vadd.f32 %v388_v26, %v387_v22  ;;  %v453_v22 = vld [vmem:[%s329_s27] sm:$0xff] }
  0x28   : > { %v390_v31 = vrot.slane %v389_v29, 2 }
  0x2a   : > { %v391_v32 = vadd.f32 %v390_v31, %v389_v29 }
  0x2c   : > { %v392_v33 = vrot.slane %v391_v32, 1 }
  0x2e   : > { %v393_v34 = vadd.f32 %v392_v33, %v391_v32 }
  0x31   : > { %462 = vadd.xlane.f32.xlu0 %v386_v20  ;;  %v642_v21 = vpop.eup %641 }
  0x32   : > { %v367_v23 = vrot.slane %v642_v21, 4 }
  0x34   : > { %v368_v24 = vadd.f32 %v642_v21, %v367_v23 }
  0x36   : > { %v369_v25 = vrot.slane %v368_v24, 2 }
  0x38   : > { %v370_v27 = vadd.f32 %v369_v25, %v368_v24 }
  0x3a   : > { %v371_v28 = vrot.slane %v370_v27, 1 }
  0x3c   : > { %v372_v30 = vadd.f32 %v371_v28, %v370_v27 }
  0x3e   : > { %643 = vlog2.f32 %v372_v30 }
  0x3f   : > { %645 = vrcp.f32 %v372_v30 }
  0x4b   : > { %v644_v35 = vpop.eup %643 }
  0x4c   : > { %v374_v36 = vmul.f32 0.6931472, %v644_v35  ;;  %v646_v38 = vpop.eup %645 }
  0x4d   : > { %v376_v41 = vmul.f32 %v646_v38, %v608_v39 }
  0x4e   : > { %v394_v37 = vsub.f32 %v374_v36, %v393_v34 }
  0x4f   : > { %v377_v42 = vmul.f32 %v642_v21, %v376_v41 }
  0x50   : > { %v395_v40 = vmul.f32 %v608_v39, %v394_v37 }
  0x51   : > { %v396_v43 = vmul.f32 %v386_v20, %v377_v42 }
  0x53   : > { %v397_v44 = vrot.slane %v396_v43, 4 }
  0x55   : > { %v398_v45 = vadd.f32 %v397_v44, %v396_v43 }
  0x57   : > { %v399_v46 = vrot.slane %v398_v45, 2 }
  0x59   : > { %v400_v47 = vadd.f32 %v399_v46, %v398_v45 }
  0x5b   : > { %v401_v48 = vrot.slane %v400_v47, 1 }
  0x5d   : > { %v402_v49 = vadd.f32 %v401_v48, %v400_v47 }
  0x5f   : > { %v427_v50 = vsub.f32 1.0, %v402_v49 }
  0x61   : > { %v428_v51 = vmax.f32 %v427_v50, 0.0 }
  0x63   : > { %v429_v52 = vmax.f32 %v428_v51, 1e-30 }
  0x65   : > { %647 = vlog2.f32 %v429_v52 }
  0x72   : > { %v648_v60 = vpop.eup %647 }
  0x73   : > { %v431_v0 = vmul.f32 0.6931472, %v648_v60 }
  0x89   : > { %v418_v53 = vpop.permute.xlu0 %417 }
  0x8a   : > { %v420_v54 = vmul.f32 %v418_v53, %v386_v20 }
  0x8c   : > { %v421_v55 = vrot.slane %v420_v54, 4 }
  0x8d   : > { %v406_v56 = vpop.permute.xlu0 %405 }
  0x8e   : > { %v422_v57 = vadd.f32 %v421_v55, %v420_v54  ;;  %v408_v59 = vmul.f32 %v406_v56, %v386_v20 }
  0x90   : > { %v423_v58 = vrot.slane %v422_v57, 2  ;;  %v409_v63 = vrot.slane %v408_v59, 4 }
  0x92   : > { %v424_v61 = vadd.f32 %v423_v58, %v422_v57  ;;  %v410_v2 = vadd.f32 %v409_v63, %v408_v59 }
  0x94   : > { %v425_v62 = vrot.slane %v424_v61, 1  ;;  %v411_v5 = vrot.slane %v410_v2, 2 }
  0x96   : > { %v426_v1 = vadd.f32 %v425_v62, %v424_v61  ;;  %v412_v6 = vadd.f32 %v411_v5, %v410_v2 }
  0x98   : > { %v432_v3 = vmul.f32 %v431_v0, %v426_v1  ;;  %v413_v7 = vrot.slane %v412_v6, 1 }
  0x9a   : > { %v433_v4 = vmul.f32 1.442695, %v432_v3  ;;  %v414_v8 = vadd.f32 %v413_v7, %v412_v6 }
  0x9c   : > { %649 = vpow2.f32 %v433_v4 }
  0xa9   : > { %v650_v9 = vpop.eup %649 }
  0xaa   : > { %v436_v10 = vmul.f32 %v650_v9, %v414_v8 }
  0xac   : > { %v437_v11 = vmul.f32 %v436_v10, %v395_v40 }
  0xae   : > { %v439_v12 = vsel %vm438_vm3, %v437_v11, 0.0 }
  0xaf   : > { %440 = vadd.xlane.f32.xlu1 %v439_v12 }
  0xb3   : > { %460 = vadd.xlane.f32.xlu1 %v377_v42 }
  0xb7   : > { %454 = vadd.xlane.f32.xlu1 %v396_v43 }
  0xba   : > { %v463_v15 = vpop.xlane.xlu0 %462 }
 0x138   : > { %v441_v13 = vpop.xlane.xlu1 %440 }
 0x139   : > { %v442_v14 = vrot.slane %v441_v13, 4 }
 0x13b   : > { %v443_v16 = vadd.f32 %v442_v14, %v441_v13 }
 0x13c   : > { %v461_v18 = vpop.xlane.xlu1 %460 }
 0x13d   : > { %v444_v20 = vrot.slane %v443_v16, 2  ;;  %v464_v21 = vadd.f32 %v463_v15, %v461_v18 }
 0x13f   : > { %v445_v23 = vadd.f32 %v444_v20, %v443_v16  ;;  %v465_v24 = vadd.f32 %v464_v21, %v459_v17 }
 0x140   : > { %v455_v25 = vpop.xlane.xlu1 %454 }
 0x141   : > { %v446_v26 = vrot.slane %v445_v23, 1  ;;  %466 = vst.msk [vmem:[%s333_s20] sm:$0xff] %vm340_vm4, %v465_v24  ;;  %v456_v27 = vadd.f32 %v455_v25, %v453_v22 }
 0x143   : > { %v447_v28 = vadd.f32 %v446_v26, %v445_v23  ;;  %458 = vst.msk [vmem:[%s329_s27] sm:$0xff] %vm340_vm4, %v456_v27 }
 0x145   : > { %612 = vpush %v447_v28 }
 0x176   : > { %s613_s21 = spop %612 }
 0x177   : > { %v449_v29 = vstv %s613_s21 }
 0x178   : > { %v450_v30 = vadd.f32 %v449_v29, %v435_v19 }
 0x17a   : > { %452 = vst.msk [vmem:[%s325_s17] sm:$0x1] %vm338_vm5, %v450_v30 }
 0x17b PF: > { %s17_s23 = sadd.s32 1, %s673_s23   ;;  %s786_s21 = smov %s669_s22 }
 0x17c   : > { %p14_p5 = scmp.ge.s32.totalorder %s17_s23, 4   ;;  %s787_s22 = smov %s789_s24 }
 0x17e   :  { %16 = sbr.rel (!%p14_p5) target bundleno = 2 (0x2), region = 97 }

</bundles_post_ra>
